<compile_context>
chip_gen: v7x
topology: tpu7x:2x2x1
jax: 0.10.0
libtpu: 0.0.40
codegen_flags: <defaults>
</compile_context>

<pallas_src>
import functools

import jax
import jax.numpy as jnp
from jax import lax
from jax.experimental import pallas as pl
from jax.experimental.pallas import tpu as pltpu


def _ce_label_smooth_kernel(x_ref, t_ref, out_ref, acc_ref, *,
                            num_classes, epsilon, n_total):
    i = pl.program_id(0)

    @pl.when(i == 0)
    def _():
        acc_ref[0] = jnp.float32(0.0)

    x = x_ref[...].astype(jnp.float32)           # (TN, C), cast per-tile
    t = t_ref[...]                               # (TN, 1) int32
    tn, c = x.shape

    # numerically stable log-softmax along classes (dim=1)
    m = jnp.max(x, axis=1, keepdims=True)
    shifted = x - m
    lse = jnp.log(jnp.sum(jnp.exp(shifted), axis=1, keepdims=True))
    log_probs = shifted - lse                    # (TN, C)

    # label smoothing without materializing the smoothed one-hot:
    #   loss_i = -(1-eps) * log_p[i, t_i] - (eps/C) * sum_c log_p[i, c]
    class_ids = lax.broadcasted_iota(jnp.int32, (tn, c), 1)
    target_lp = jnp.sum(jnp.where(class_ids == t, log_probs, 0.0),
                        axis=1, keepdims=True)                   # (TN, 1)
    row_lp_sum = jnp.sum(log_probs, axis=1, keepdims=True)       # (TN, 1)
    per_row = (-(1.0 - epsilon) * target_lp
               - (epsilon / num_classes) * row_lp_sum)           # (TN, 1)

    # mask padded tail rows so they do not contribute to the loss
    row_ids = i * tn + lax.broadcasted_iota(jnp.int32, (tn, 1), 0)
    valid = (row_ids < n_total).astype(jnp.float32)
    acc_ref[0] += jnp.sum(per_row * valid)

    @pl.when(i == pl.num_programs(0) - 1)
    def _():
        out_ref[0, 0] = acc_ref[0] / jnp.float32(n_total)


def cross_entropy_label_smooth(inputs, targets, num_classes, epsilon,
                               *, block_rows=512):
    """inputs: (N, C) float logits (any float dtype); targets: (N,) int labels.

    Returns the scalar label-smoothed cross-entropy loss, matching
    (-smoothed_targets * log_softmax(inputs)).mean(0).sum().
    """
    n, c = inputs.shape
    assert c == num_classes

    # Batch tile: multiple of 8 sublanes, capped by a conservative per-buffer
    # VMEM budget (~4 MiB; double-buffered ~8 MiB) so it fits the smaller
    # scoped-VMEM defaults on v5e / v7x while still reaching HBM roofline.
    itemsize = jnp.dtype(inputs.dtype).itemsize
    max_rows_by_vmem = max(8, (4 * 1024 * 1024) // max(1, c * itemsize))
    tn = min(block_rows, max_rows_by_vmem, max(n, 8))
    tn = max(8, (tn // 8) * 8)

    n_pad = pl.cdiv(n, tn) * tn
    if n_pad != n:
        # zero-pad tail rows (finite log-probs); masked out inside the kernel
        inputs = jnp.pad(inputs, ((0, n_pad - n), (0, 0)))
        targets = jnp.pad(targets, (0, n_pad - n))
    targets_2d = targets.astype(jnp.int32).reshape(n_pad, 1)

    kernel = functools.partial(
        _ce_label_smooth_kernel,
        num_classes=num_classes,
        epsilon=float(epsilon),
        n_total=n,
    )

    out = pl.pallas_call(
        kernel,
        out_shape=jax.ShapeDtypeStruct((1, 1), jnp.float32),
        grid=(n_pad // tn,),
        in_specs=[
            pl.BlockSpec((tn, c), lambda i: (i, 0)),
            pl.BlockSpec((tn, 1), lambda i: (i, 0)),
        ],
        out_specs=pl.BlockSpec(memory_space=pltpu.MemorySpace.SMEM),
        scratch_shapes=[pltpu.SMEM((1,), jnp.float32)],
        compiler_params=pltpu.CompilerParams(
            dimension_semantics=("arbitrary",)),
    )(inputs, targets_2d)  # native dtype straight in — no wrapper up-cast
    return out[0, 0]


if __name__ == "__main__":
    num_classes = 16
    epsilon = 0.1
    batch = 8

    key = jax.random.PRNGKey(0)
    k1, k2 = jax.random.split(key)
    logits = jax.random.normal(k1, (batch, num_classes), dtype=jnp.float32)
    labels = jax.random.randint(k2, (batch,), 0, num_classes, dtype=jnp.int32)

    loss = cross_entropy_label_smooth(logits, labels, num_classes, epsilon)
    loss = jax.block_until_ready(loss)

    # reference (pure JAX) check
    logp = jax.nn.log_softmax(logits, axis=1)
    onehot = jax.nn.one_hot(labels, num_classes, dtype=jnp.float32)
    smoothed = (1.0 - epsilon) * onehot + epsilon / num_classes
    ref = jnp.sum(jnp.mean(-smoothed * logp, axis=0))
    assert jnp.allclose(loss, ref, rtol=1e-5, atol=1e-5), (loss, ref)

    print("KERNEL_OK")
</pallas_src>

<mosaic_0001>
module attributes {stable_mosaic.version = 11 : i64} {
  func.func @_ce_label_smooth_kernel(%arg0: i32, %arg1: memref<8x16xf32, #tpu.memory_space<vmem>>, %arg2: memref<8x1xi32, #tpu.memory_space<vmem>>, %arg3: memref<1x1xf32, #tpu.memory_space<smem>>, %arg4: memref<1xf32, #tpu.memory_space<smem>>) attributes {dimension_semantics = [#tpu.dimension_semantics<arbitrary>], iteration_bounds = array<i64: 1>, scalar_prefetch = 0 : i64, scratch_operands = 1 : i64, tpu.core_type = #tpu.core_type<tc>, window_params = [{transform_indices = @transform_0, window_bounds = array<i64: 8, 16>}, {transform_indices = @transform_1, window_bounds = array<i64: 8, 1>}, {transform_indices = @transform_2, window_bounds = array<i64: 1, 1>}]} {
    %c0_i32 = arith.constant 0 : i32
    %0 = arith.cmpi eq, %arg0, %c0_i32 : i32
    %1 = arith.extui %0 : i1 to i32
    %c0_i32_0 = arith.constant 0 : i32
    %2 = arith.cmpi ne, %1, %c0_i32_0 : i32
    scf.if %2 {
      %cst_16 = arith.constant 0.000000e+00 : f32
      %c0_17 = arith.constant 0 : index
      %48 = memref.load %arg4[%c0_17] : memref<1xf32, #tpu.memory_space<smem>>
      memref.store %cst_16, %arg4[%c0_17] : memref<1xf32, #tpu.memory_space<smem>>
    } else {
    }
    %c0 = arith.constant 0 : index
    %c0_1 = arith.constant 0 : index
    %3 = vector.load %arg1[%c0, %c0_1] : memref<8x16xf32, #tpu.memory_space<vmem>>, vector<8x16xf32>
    %c0_2 = arith.constant 0 : index
    %c0_3 = arith.constant 0 : index
    %4 = vector.load %arg2[%c0_2, %c0_3] : memref<8x1xi32, #tpu.memory_space<vmem>>, vector<8x1xi32>
    %cst = arith.constant dense<0xFF800000> : vector<8xf32>
    %5 = vector.multi_reduction <maximumf>, %3, %cst [1] : vector<8x16xf32> to vector<8xf32>
    %6 = vector.shape_cast %5 : vector<8xf32> to vector<8x1xf32>
    %7 = vector.broadcast %6 : vector<8x1xf32> to vector<8x16xf32>
    %8 = arith.subf %3, %7 : vector<8x16xf32>
    %9 = math.exp %8 : vector<8x16xf32>
    %cst_4 = arith.constant dense<0.000000e+00> : vector<8xf32>
    %10 = vector.multi_reduction <add>, %9, %cst_4 [1] : vector<8x16xf32> to vector<8xf32>
    %11 = vector.shape_cast %10 : vector<8xf32> to vector<8x1xf32>
    %12 = math.log %11 : vector<8x1xf32>
    %13 = vector.broadcast %12 : vector<8x1xf32> to vector<8x16xf32>
    %14 = arith.subf %8, %13 : vector<8x16xf32>
    %15 = tpu.iota {dimensions = array<i32: 1>} : vector<8x16xi32>
    %16 = vector.broadcast %4 : vector<8x1xi32> to vector<8x16xi32>
    %17 = arith.cmpi eq, %15, %16 : vector<8x16xi32>
    %cst_5 = arith.constant 0.000000e+00 : f32
    %18 = vector.broadcast %cst_5 : f32 to vector<8x16xf32>
    %19 = arith.select %17, %14, %18 : vector<8x16xi1>, vector<8x16xf32>
    %cst_6 = arith.constant dense<0.000000e+00> : vector<8xf32>
    %20 = vector.multi_reduction <add>, %19, %cst_6 [1] : vector<8x16xf32> to vector<8xf32>
    %21 = vector.shape_cast %20 : vector<8xf32> to vector<8x1xf32>
    %cst_7 = arith.constant dense<0.000000e+00> : vector<8xf32>
    %22 = vector.multi_reduction <add>, %14, %cst_7 [1] : vector<8x16xf32> to vector<8xf32>
    %23 = vector.shape_cast %22 : vector<8xf32> to vector<8x1xf32>
    %cst_8 = arith.constant -0.899999976 : f32
    %24 = vector.broadcast %cst_8 : f32 to vector<8x1xf32>
    %25 = arith.mulf %24, %21 : vector<8x1xf32>
    %cst_9 = arith.constant 6.250000e-03 : f32
    %26 = vector.broadcast %cst_9 : f32 to vector<8x1xf32>
    %27 = arith.mulf %26, %23 : vector<8x1xf32>
    %28 = arith.subf %25, %27 : vector<8x1xf32>
    %c8_i32 = arith.constant 8 : i32
    %29 = arith.muli %arg0, %c8_i32 : i32
    %30 = tpu.iota {dimensions = array<i32: 0>} : vector<8x1xi32>
    %31 = vector.broadcast %29 : i32 to vector<8x1xi32>
    %32 = arith.addi %31, %30 : vector<8x1xi32>
    %c8_i32_10 = arith.constant 8 : i32
    %33 = vector.broadcast %c8_i32_10 : i32 to vector<8x1xi32>
    %34 = arith.cmpi slt, %32, %33 : vector<8x1xi32>
    %35 = arith.extui %34 : vector<8x1xi1> to vector<8x1xi32>
    %36 = arith.sitofp %35 : vector<8x1xi32> to vector<8x1xf32>
    %c0_11 = arith.constant 0 : index
    %37 = memref.load %arg4[%c0_11] : memref<1xf32, #tpu.memory_space<smem>>
    %38 = arith.mulf %28, %36 : vector<8x1xf32>
    %39 = vector.shape_cast %38 : vector<8x1xf32> to vector<1x8x1xf32>
    %cst_12 = arith.constant dense<0.000000e+00> : vector<1xf32>
    %40 = vector.multi_reduction <add>, %39, %cst_12 [1, 2] : vector<1x8x1xf32> to vector<1xf32>
    %41 = vector.shape_cast %40 : vector<1xf32> to vector<1x1x1xf32>
    %42 = vector.extract %41[0, 0, 0] : f32 from vector<1x1x1xf32>
    %43 = arith.addf %37, %42 : f32
    %c0_13 = arith.constant 0 : index
    %44 = memref.load %arg4[%c0_13] : memref<1xf32, #tpu.memory_space<smem>>
    memref.store %43, %arg4[%c0_13] : memref<1xf32, #tpu.memory_space<smem>>
    %c0_i32_14 = arith.constant 0 : i32
    %45 = arith.cmpi eq, %arg0, %c0_i32_14 : i32
    %46 = arith.extui %45 : i1 to i32
    %c0_i32_15 = arith.constant 0 : i32
    %47 = arith.cmpi ne, %46, %c0_i32_15 : i32
    scf.if %47 {
      %c0_16 = arith.constant 0 : index
      %48 = memref.load %arg4[%c0_16] : memref<1xf32, #tpu.memory_space<smem>>
      %cst_17 = arith.constant 8.000000e+00 : f32
      %49 = arith.divf %48, %cst_17 : f32
      %c0_18 = arith.constant 0 : index
      %c0_19 = arith.constant 0 : index
      %50 = memref.load %arg3[%c0_18, %c0_19] : memref<1x1xf32, #tpu.memory_space<smem>>
      memref.store %49, %arg3[%c0_18, %c0_19] : memref<1x1xf32, #tpu.memory_space<smem>>
    } else {
    }
    return
  }
  func.func @transform_0(%arg0: i32) -> (i32, i32) {
    %c0_i32 = arith.constant 0 : i32
    %c0_i32_0 = arith.constant 0 : i32
    return %arg0, %c0_i32 : i32, i32
  }
  func.func @transform_1(%arg0: i32) -> (i32, i32) {
    %c0_i32 = arith.constant 0 : i32
    %c0_i32_0 = arith.constant 0 : i32
    return %arg0, %c0_i32 : i32, i32
  }
  func.func @transform_2(%arg0: i32) -> (i32, i32) {
    %c0_i32 = arith.constant 0 : i32
    %c0_i32_0 = arith.constant 0 : i32
    %c0_i32_1 = arith.constant 0 : i32
    return %c0_i32, %c0_i32_0 : i32, i32
  }
}

</mosaic_0001>

<bundles_post_ra>
// kernel: tpu_custom_call.1
= control target key start
LH: loop header
LB: loop body
LE: loop exit
PB: predicated region body
PF: predicated region fallthrough
CT: control target
= control target key end

     0   :  { %vm20_vm0 = vcmask 130048   ;;  %s156_s0 = inlined_call_operand.vmem [shape: f32[8,16], index: 0, kind: input, shape index: {}]   ;;  %s157_s1 = inlined_call_operand.vmem [shape: s32[8,1], index: 1, kind: input, shape index: {}]   ;;  %s158_s2 = inlined_call_operand.hbm [shape: f32[1,1], index: 2, kind: output, shape index: {}]  }
   0x1   :  { %v18_v0 = vld [vmem:[%s156_s0] sm:$0xff] }
   0x2   :  { %7 = vsyncpa [#allocation4], 0  ;;  %v21_v1 = vsel %vm20_vm0, %v18_v0, -inf  ;;  %v19_v2 = vld [vmem:[%s157_s1] sm:$0xff]  ;;  %v117_v3 = vmov 0   ;;  %v33_v10 = vlaneseq  ;;  %vm59_vm2 = vcmask 7168  }
   0x3   :  { %22 = vmax.xlane.f32.xlu0 %v21_v1  ;;  %99 = vset.pattern.permute.xlu1 %v117_v3  ;;  %s105_s15 = scalar_lea.hbm %s158_s2, 16 }
   0x4   :  { %100 = vset.pattern.permute.xlu0 %v117_v3  ;;  %36 = vperm.xlu1 %99, %v19_v2   ;;  %v34_v11 = vand.u32 127, %v33_v10  ;;  %p106_p0 = scmp.ne.s32.totalorder %s158_s2, %s105_s15  ;;  %p109_p1 = scmp.lt.u32.totalorder %s105_s15, %s158_s2 }
   0x6   :  { %p111_p2 = pnand %p109_p1, %p106_p0 }
  0x83   :  { %v37_v12 = vpop.permute.xlu1 %36 }
  0x84   :  { %vm38_vm1 = vcmp.eq.s32.totalorder %v34_v11, %v37_v12 }
  0x90   :  { %v23_v4 = vpop.xlane.xlu0 %22 }
  0x91   :  { %v24_v5 = vsub.f32 %v18_v0, %v23_v4 }
  0x93   :  { %v25_v6 = vmul.f32 1.442695, %v24_v5 }
  0x95   :  { %101 = vpow2.f32 %v25_v6 }
  0x9f   :  { %v102_v7 = vpop.eup %101 }
  0xa0   :  { %v27_v8 = vsel %vm20_vm0, %v102_v7, 0.0 }
  0xa1   :  { %28 = vadd.xlane.f32.xlu0 %v27_v8 }
 0x12e   :  { %v29_v9 = vpop.xlane.xlu0 %28 }
 0x12f   :  { %103 = vlog2.f32 %v29_v9 }
 0x139   :  { %v104_v13 = vpop.eup %103 }
 0x13a   :  { %v31_v14 = vmul.f32 0.6931472, %v104_v13 }
 0x13c   :  { %v32_v15 = vsub.f32 %v24_v5, %v31_v14 }
 0x13e   :  { %v43_v16 = vsel %vm20_vm0, %v32_v15, 0.0  ;;  %v39_v17 = vsel %vm38_vm1, %v32_v15, 0.0 }
 0x13f   :  { %44 = vadd.xlane.f32.xlu0 %v43_v16  ;;  %v40_v18 = vsel %vm20_vm0, %v39_v17, 0.0 }
 0x140   :  { %41 = vadd.xlane.f32.xlu1 %v40_v18 }
 0x1cc   :  { %v45_v19 = vpop.xlane.xlu0 %44 }
 0x1cd   :  { %v47_v20 = vmul.f32 0.00625, %v45_v19  ;;  %v42_v21 = vpop.xlane.xlu1 %41 }
 0x1ce   :  { %v46_v22 = vmul.f32 -0.9, %v42_v21 }
 0x1d0   :  { %v48_v23 = vsub.f32 %v46_v22, %v47_v20 }
 0x1d2   :  { %v60_v24 = vsel %vm59_vm2, %v48_v23, 0.0 }
 0x1d3   :  { %61 = vadd.xlane.f32.xlu0 %v60_v24 }
 0x260   :  { %v62_v25 = vpop.xlane.xlu0 %61 }
 0x261   :  { %v63_v26 = vrot.slane %v62_v25, 4 }
 0x263   :  { %v64_v27 = vadd.f32 %v63_v26, %v62_v25 }
 0x265   :  { %v65_v28 = vrot.slane %v64_v27, 2 }
 0x267   :  { %v66_v29 = vadd.f32 %v65_v28, %v64_v27 }
 0x269   :  { %v67_v30 = vrot.slane %v66_v29, 1 }
 0x26b   :  { %v68_v31 = vadd.f32 %v67_v30, %v66_v29 }
 0x26d   :  { %95 = vpush %v68_v31 }
 0x29e   :  { %s96_s0 = spop %95 }
 0x29f   :  { %s79_s1 = smul.f32 0.125, %s96_s0 }
 0x2a1   :  { %81 = sst [smem:[#allocation3]] %s79_s1 }
 0x2a2   :  { %114 = shalt.err (!%p111_p2)
}
 0x2a3   :  { %s118_s20 = smov [#allocation3]  }
 0x2a4   :  { %89 = dma.smem_to_hbm %s118_s20, 16, %s158_s2, [#allocation4]  }
 0x2a5   :  { %115 = dma.done.wait [#allocation4], 16  }
 0x2a6   :  { %116 = vsyncadd [#allocation4], 4294967280 }
 0x2a7   :  { %93 = sfence }
 0x2a8   :  { %94 = vsyncpa [#allocation4], 1 }

</bundles_post_ra>
